<compile_context>
chip_gen: v7x
topology: tpu7x:2x2x1
jax: 0.10.0
libtpu: 0.0.40
codegen_flags: <defaults>
</compile_context>

<pallas_src>
import functools

import jax
import jax.numpy as jnp
from jax.experimental import pallas as pl
from jax.experimental.pallas import tpu as pltpu

_LANE = 128


def _round_up(x, m):
    return ((x + m - 1) // m) * m


def _focal_kernel(logits_ref, labels_ref, alpha_ref, loss_ref, acc_ref, *, gamma):
    # Zero the resident element-wise accumulator on the first grid step.
    @pl.when(pl.program_id(0) == 0)
    def _init():
        acc_ref[...] = jnp.zeros_like(acc_ref)

    x = logits_ref[...].astype(jnp.float32)           # (C, S, 128) f32 compute
    t = labels_ref[...]                               # (S, 128) int32, -1 = pad
    a = alpha_ref[...].astype(jnp.float32)            # (C, 1, 1)

    # Log-sum-exp over the class axis (leading dim -> plain VPU max/add chain,
    # exp runs once over dense (S, 128) planes).
    m = jnp.max(x, axis=0)                            # (S, 128)
    e = jnp.exp(x - m[None])                          # (C, S, 128) dense EUP
    s = jnp.sum(e, axis=0)                            # (S, 128)

    # "Gather" of the target class as a one-hot contraction over C
    # (no scatter/gather op).
    cls = jax.lax.broadcasted_iota(jnp.int32, x.shape, 0)
    one_hot = (cls == t[None]).astype(jnp.float32)    # (C, S, 128)
    x_t = jnp.sum(one_hot * x, axis=0)                # target logit
    e_t = jnp.sum(one_hot * e, axis=0)                # exp(target - max)
    a_t = jnp.sum(one_hot * a, axis=0)                # target alpha

    log_p_t = x_t - m - jnp.log(s)                    # log softmax @ target
    p_t = e_t / s                                     # softmax @ target (reuses e)
    q = 1.0 - p_t

    g = float(gamma)
    if g.is_integer() and 0.0 <= g <= 8.0:
        focal = jnp.ones_like(q)
        for _ in range(int(g)):
            focal = focal * q                         # VPU multiplies, no EUP pow
    else:
        focal = jnp.power(q, g)

    per_elem = -a_t * focal * log_p_t                 # (S, 128)
    per_elem = jnp.where(t >= 0, per_elem, 0.0)       # mask padded rows
    acc_ref[...] += per_elem

    # Single full reduce to the scalar output on the final step.
    @pl.when(pl.program_id(0) == pl.num_programs(0) - 1)
    def _finalize():
        loss_ref[...] = jnp.sum(acc_ref[...], keepdims=True)


def focal_loss_yt(preds, labels, *, alpha=0.25, gamma=2, num_classes=3,
                  size_average=True, row_tile=8192):
    """Forward pass of FocalLoss_yt. Returns a float32 scalar."""
    C = preds.shape[-1]
    assert C == num_classes, (C, num_classes)

    # Per-class alpha vector, mirroring the PyTorch constructor.
    if isinstance(alpha, (list, tuple)):
        assert len(alpha) == num_classes
        alpha_vec = jnp.asarray(alpha, dtype=jnp.float32)
    else:
        assert alpha < 1
        alpha_vec = jnp.full((num_classes,), 1.0 - alpha, dtype=jnp.float32)
        alpha_vec = alpha_vec.at[0].set(alpha)
    alpha_arr = alpha_vec.reshape(C, 1, 1)

    logits = preds.reshape(-1, C)                     # keep original dtype
    rows = logits.shape[0]
    labels1d = labels.reshape(-1).astype(jnp.int32)

    # Rows occupy the full (sublane, lane) plane: tile = (C, tb_sub, 128).
    n_sub_needed = pl.cdiv(rows, _LANE)               # sublane-rows needed
    max_sub = max(1, row_tile // _LANE)
    if n_sub_needed <= max_sub:
        tb_sub = max(1, n_sub_needed)                 # single tile: any extent ok
        n_tiles = 1
    else:
        tb_sub = _round_up(max_sub, 8)                # multi-tile: multiple of 8
        n_tiles = pl.cdiv(n_sub_needed, tb_sub)
    rows_pad = n_tiles * tb_sub * _LANE

    if rows_pad != rows:
        logits = jnp.pad(logits, ((0, rows_pad - rows), (0, 0)))
        labels1d = jnp.pad(labels1d, (0, rows_pad - rows), constant_values=-1)

    # One relayout pass in XLA (cheap vs. the saved in-kernel EUP/VPU work).
    logits_t = logits.T.reshape(C, rows_pad // _LANE, _LANE)
    labels_t = labels1d.reshape(rows_pad // _LANE, _LANE)

    kernel = functools.partial(_focal_kernel, gamma=gamma)

    loss_sum = pl.pallas_call(
        kernel,
        out_shape=jax.ShapeDtypeStruct((1, 1), jnp.float32),
        grid=(n_tiles,),
        in_specs=[
            pl.BlockSpec((C, tb_sub, _LANE), lambda i: (0, i, 0)),  # logits tile
            pl.BlockSpec((tb_sub, _LANE), lambda i: (i, 0)),        # labels tile
            pl.BlockSpec((C, 1, 1), lambda i: (0, 0, 0)),           # alpha (resident)
        ],
        out_specs=pl.BlockSpec((1, 1), lambda i: (0, 0)),
        scratch_shapes=[pltpu.VMEM((tb_sub, _LANE), jnp.float32)],
        compiler_params=pltpu.CompilerParams(
            dimension_semantics=("arbitrary",)),
    )(logits_t, labels_t, alpha_arr)

    total = loss_sum[0, 0]
    if size_average:
        return total / jnp.float32(rows)
    return total


def _focal_loss_ref(preds, labels, alpha_vec, gamma, size_average=True):
    # Pure-JAX reference mirroring the PyTorch module.
    x = preds.reshape(-1, preds.shape[-1]).astype(jnp.float32)
    y = labels.reshape(-1)
    log_p = jax.nn.log_softmax(x, axis=-1)
    p = jnp.exp(log_p)
    p_t = jnp.take_along_axis(p, y[:, None], axis=1)[:, 0]
    log_p_t = jnp.take_along_axis(log_p, y[:, None], axis=1)[:, 0]
    a_t = alpha_vec.reshape(-1)[y]
    loss = -a_t * jnp.power(1.0 - p_t, gamma) * log_p_t
    return loss.mean() if size_average else loss.sum()


if __name__ == "__main__":
    num_classes = 3
    B, N = 4, 8                                       # preds [B, N, C], labels [B, N]

    key = jax.random.PRNGKey(0)
    k_logits, k_labels = jax.random.split(key)
    preds = jax.random.normal(k_logits, (B, N, num_classes), dtype=jnp.float32)
    labels = jax.random.randint(k_labels, (B, N), 0, num_classes, dtype=jnp.int32)

    out = focal_loss_yt(preds, labels, alpha=0.25, gamma=2,
                        num_classes=num_classes, size_average=True)
    out = jax.block_until_ready(out)

    alpha_vec = jnp.full((num_classes,), 0.75, dtype=jnp.float32).at[0].set(0.25)
    ref = _focal_loss_ref(preds, labels, alpha_vec, 2.0, size_average=True)
    assert jnp.allclose(out, ref, rtol=1e-5, atol=1e-6), (out, ref)

    print("KERNEL_OK")
</pallas_src>

<mosaic_0001>
module attributes {stable_mosaic.version = 11 : i64} {
  func.func @_focal_kernel(%arg0: i32, %arg1: memref<3x1x128xf32, #tpu.memory_space<vmem>>, %arg2: memref<1x128xi32, #tpu.memory_space<vmem>>, %arg3: memref<3x1x1xf32, #tpu.memory_space<vmem>>, %arg4: memref<1x1xf32, #tpu.memory_space<vmem>>, %arg5: memref<1x128xf32, #tpu.memory_space<vmem>>) attributes {dimension_semantics = [#tpu.dimension_semantics<arbitrary>], iteration_bounds = array<i64: 1>, scalar_prefetch = 0 : i64, scratch_operands = 1 : i64, tpu.core_type = #tpu.core_type<tc>, window_params = [{transform_indices = @transform_0, window_bounds = array<i64: 3, 1, 128>}, {transform_indices = @transform_1, window_bounds = array<i64: 1, 128>}, {pipeline_mode = #tpu.pipeline_mode<synchronous>, transform_indices = @transform_2, window_bounds = array<i64: 3, 1, 1>}, {pipeline_mode = #tpu.pipeline_mode<synchronous>, transform_indices = @transform_3, window_bounds = array<i64: 1, 1>}]} {
    %c0_i32 = arith.constant 0 : i32
    %0 = arith.cmpi eq, %arg0, %c0_i32 : i32
    %1 = arith.extui %0 : i1 to i32
    %c0_i32_0 = arith.constant 0 : i32
    %2 = arith.cmpi ne, %1, %c0_i32_0 : i32
    scf.if %2 {
      %cst_23 = arith.constant 0.000000e+00 : f32
      %48 = vector.broadcast %cst_23 : f32 to vector<1x128xf32>
      %c0_24 = arith.constant 0 : index
      %c0_25 = arith.constant 0 : index
      %49 = vector.load %arg5[%c0_24, %c0_25] : memref<1x128xf32, #tpu.memory_space<vmem>>, vector<1x128xf32>
      tpu.vector_store %arg5[%c0_24, %c0_25], %48 {strides = array<i32>} : memref<1x128xf32, #tpu.memory_space<vmem>>, vector<1x128xf32>,
    } else {
    }
    %c0 = arith.constant 0 : index
    %c0_1 = arith.constant 0 : index
    %c0_2 = arith.constant 0 : index
    %3 = vector.load %arg1[%c0, %c0_1, %c0_2] : memref<3x1x128xf32, #tpu.memory_space<vmem>>, vector<3x1x128xf32>
    %c0_3 = arith.constant 0 : index
    %c0_4 = arith.constant 0 : index
    %4 = vector.load %arg2[%c0_3, %c0_4] : memref<1x128xi32, #tpu.memory_space<vmem>>, vector<1x128xi32>
    %c0_5 = arith.constant 0 : index
    %c0_6 = arith.constant 0 : index
    %c0_7 = arith.constant 0 : index
    %5 = vector.load %arg3[%c0_5, %c0_6, %c0_7] : memref<3x1x1xf32, #tpu.memory_space<vmem>>, vector<3x1x1xf32>
    %cst = arith.constant dense<0xFF800000> : vector<1x128xf32>
    %6 = vector.multi_reduction <maximumf>, %3, %cst [0] : vector<3x1x128xf32> to vector<1x128xf32>
    %7 = vector.shape_cast %6 : vector<1x128xf32> to vector<1x1x128xf32>
    %8 = vector.broadcast %7 : vector<1x1x128xf32> to vector<3x1x128xf32>
    %9 = arith.subf %3, %8 : vector<3x1x128xf32>
    %10 = math.exp %9 : vector<3x1x128xf32>
    %cst_8 = arith.constant dense<0.000000e+00> : vector<1x128xf32>
    %11 = vector.multi_reduction <add>, %10, %cst_8 [0] : vector<3x1x128xf32> to vector<1x128xf32>
    %12 = tpu.iota {dimensions = array<i32: 0>} : vector<3x1x128xi32>
    %13 = vector.shape_cast %4 : vector<1x128xi32> to vector<1x1x128xi32>
    %14 = vector.broadcast %13 : vector<1x1x128xi32> to vector<3x1x128xi32>
    %15 = arith.cmpi eq, %12, %14 : vector<3x1x128xi32>
    %16 = arith.extui %15 : vector<3x1x128xi1> to vector<3x1x128xi32>
    %17 = arith.sitofp %16 : vector<3x1x128xi32> to vector<3x1x128xf32>
    %18 = arith.mulf %17, %3 : vector<3x1x128xf32>
    %cst_9 = arith.constant dense<0.000000e+00> : vector<1x128xf32>
    %19 = vector.multi_reduction <add>, %18, %cst_9 [0] : vector<3x1x128xf32> to vector<1x128xf32>
    %20 = arith.mulf %17, %10 : vector<3x1x128xf32>
    %cst_10 = arith.constant dense<0.000000e+00> : vector<1x128xf32>
    %21 = vector.multi_reduction <add>, %20, %cst_10 [0] : vector<3x1x128xf32> to vector<1x128xf32>
    %22 = vector.broadcast %5 : vector<3x1x1xf32> to vector<3x1x128xf32>
    %23 = arith.mulf %17, %22 : vector<3x1x128xf32>
    %cst_11 = arith.constant dense<0.000000e+00> : vector<1x128xf32>
    %24 = vector.multi_reduction <add>, %23, %cst_11 [0] : vector<3x1x128xf32> to vector<1x128xf32>
    %25 = arith.subf %19, %6 : vector<1x128xf32>
    %26 = math.log %11 : vector<1x128xf32>
    %27 = arith.subf %25, %26 : vector<1x128xf32>
    %28 = arith.divf %21, %11 : vector<1x128xf32>
    %cst_12 = arith.constant 1.000000e+00 : f32
    %29 = vector.broadcast %cst_12 : f32 to vector<1x128xf32>
    %30 = arith.subf %29, %28 : vector<1x128xf32>
    %cst_13 = arith.constant 1.000000e+00 : f32
    %31 = vector.broadcast %cst_13 : f32 to vector<1x128xf32>
    %32 = arith.mulf %31, %30 : vector<1x128xf32>
    %33 = arith.mulf %32, %30 : vector<1x128xf32>
    %cst_14 = arith.constant 0.000000e+00 : f32
    %34 = vector.broadcast %cst_14 : f32 to vector<1x128xf32>
    %35 = arith.subf %34, %24 : vector<1x128xf32>
    %36 = arith.mulf %35, %33 : vector<1x128xf32>
    %37 = arith.mulf %36, %27 : vector<1x128xf32>
    %c0_i32_15 = arith.constant 0 : i32
    %38 = vector.broadcast %c0_i32_15 : i32 to vector<1x128xi32>
    %39 = arith.cmpi sge, %4, %38 : vector<1x128xi32>
    %cst_16 = arith.constant 0.000000e+00 : f32
    %40 = vector.broadcast %cst_16 : f32 to vector<1x128xf32>
    %41 = arith.select %39, %37, %40 : vector<1x128xi1>, vector<1x128xf32>
    %c0_17 = arith.constant 0 : index
    %c0_18 = arith.constant 0 : index
    %42 = vector.load %arg5[%c0_17, %c0_18] : memref<1x128xf32, #tpu.memory_space<vmem>>, vector<1x128xf32>
    %43 = arith.addf %42, %41 : vector<1x128xf32>
    %c0_19 = arith.constant 0 : index
    %c0_20 = arith.constant 0 : index
    %44 = vector.load %arg5[%c0_19, %c0_20] : memref<1x128xf32, #tpu.memory_space<vmem>>, vector<1x128xf32>
    tpu.vector_store %arg5[%c0_19, %c0_20], %43 {strides = array<i32>} : memref<1x128xf32, #tpu.memory_space<vmem>>, vector<1x128xf32>,
    %c0_i32_21 = arith.constant 0 : i32
    %45 = arith.cmpi eq, %arg0, %c0_i32_21 : i32
    %46 = arith.extui %45 : i1 to i32
    %c0_i32_22 = arith.constant 0 : i32
    %47 = arith.cmpi ne, %46, %c0_i32_22 : i32
    scf.if %47 {
      %c0_23 = arith.constant 0 : index
      %c0_24 = arith.constant 0 : index
      %48 = vector.load %arg5[%c0_23, %c0_24] : memref<1x128xf32, #tpu.memory_space<vmem>>, vector<1x128xf32>
      %49 = vector.shape_cast %48 : vector<1x128xf32> to vector<1x1x128xf32>
      %cst_25 = arith.constant dense<0.000000e+00> : vector<1xf32>
      %50 = vector.multi_reduction <add>, %49, %cst_25 [1, 2] : vector<1x1x128xf32> to vector<1xf32>
      %51 = vector.shape_cast %50 : vector<1xf32> to vector<1x1x1xf32>
      %52 = vector.extract %51[0, 0, 0] : f32 from vector<1x1x1xf32>
      %53 = vector.broadcast %52 : f32 to vector<1x1xf32>
      %c0_26 = arith.constant 0 : index
      %c0_27 = arith.constant 0 : index
      %54 = vector.load %arg4[%c0_26, %c0_27] : memref<1x1xf32, #tpu.memory_space<vmem>>, vector<1x1xf32>
      tpu.vector_store %arg4[%c0_26, %c0_27], %53 {strides = array<i32>} : memref<1x1xf32, #tpu.memory_space<vmem>>, vector<1x1xf32>,
    } else {
    }
    return
  }
  func.func @transform_0(%arg0: i32) -> (i32, i32, i32) {
    %c0_i32 = arith.constant 0 : i32
    %c0_i32_0 = arith.constant 0 : i32
    %c0_i32_1 = arith.constant 0 : i32
    return %c0_i32, %arg0, %c0_i32_0 : i32, i32, i32
  }
  func.func @transform_1(%arg0: i32) -> (i32, i32) {
    %c0_i32 = arith.constant 0 : i32
    %c0_i32_0 = arith.constant 0 : i32
    return %arg0, %c0_i32 : i32, i32
  }
  func.func @transform_2(%arg0: i32) -> (i32, i32, i32) {
    %c0_i32 = arith.constant 0 : i32
    %c0_i32_0 = arith.constant 0 : i32
    %c0_i32_1 = arith.constant 0 : i32
    %c0_i32_2 = arith.constant 0 : i32
    return %c0_i32, %c0_i32_0, %c0_i32_1 : i32, i32, i32
  }
  func.func @transform_3(%arg0: i32) -> (i32, i32) {
    %c0_i32 = arith.constant 0 : i32
    %c0_i32_0 = arith.constant 0 : i32
    %c0_i32_1 = arith.constant 0 : i32
    return %c0_i32, %c0_i32_0 : i32, i32
  }
}

</mosaic_0001>

<bundles_post_ra>
// kernel: tpu_custom_call.1
= control target key start
LH: loop header
LB: loop body
LE: loop exit
PB: predicated region body
PF: predicated region fallthrough
CT: control target
= control target key end

     0   :  { %v202_v1 = vmov 0   ;;  %v203_v3 = vmov 0.0   ;;  %s277_s0 = inlined_call_operand.vmem [shape: f32[3,1,128], index: 0, kind: input, shape index: {}]   ;;  %s278_s1 = inlined_call_operand.vmem [shape: s32[1,128], index: 1, kind: input, shape index: {}]   ;;  %s279_s2 = inlined_call_operand.vmem [shape: f32[3,1,1], index: 2, kind: input, shape index: {}]   ;;  %s280_s3 = inlined_call_operand.hbm [shape: f32[1,1], index: 3, kind: output, shape index: {}]  }
   0x1   :  { %v24_v0 = vld [vmem:[%s279_s2] sm:$0x1]  ;;  %166 = vset.pattern.permute.xlu0 %v202_v1  ;;  %167 = vset.pattern.permute.xlu1 %v202_v1  ;;  %v26_v2 = vld [vmem:[%s279_s2 + $0x2] sm:$0x1]  ;;  %19 = vst [vmem:[#allocation2] sm:$0x1] %v203_v3 }
   0x2   :  { %78 = vperm.xlu0 %166, %v24_v0   ;;  %96 = vperm.xlu1 %167, %v26_v2   ;;  %v25_v4 = vld [vmem:[%s279_s2 + $0x1] sm:$0x1] }
   0x3   :  { %8 = vsyncpa [#allocation4], 0  ;;  %v27_v5 = vlaneseq  ;;  %v20_v6 = vld [vmem:[%s277_s0] sm:$0x1]  ;;  %v21_v7 = vld [vmem:[%s277_s0 + $0x1] sm:$0x1] }
   0x4   :  { %v22_v10 = vld [vmem:[%s277_s0 + $0x2] sm:$0x1]  ;;  %vm45_vm1 = vcmask 1040384   ;;  %v23_v22 = vld [vmem:[%s278_s1] sm:$0x1]  ;;  %s204_s1 = smov [#allocation3]  }
   0x5   :  { %vm29_vm0 = vcmp.lt.s32.totalorder %v27_v5, 128  ;;  %vm51_vm2 = vcmp.eq.s32.totalorder %v23_v22, 0  ;;  %vm52_vm3 = vcmp.eq.s32.totalorder %v23_v22, 1  ;;  %vm53_vm4 = vcmp.eq.s32.totalorder %v23_v22, 2  ;;  %s150_s24 = sshll.u32 %s204_s1, 4  ;;  %s151_s24 = int_to_ptr.vmem [resolvable:$true] %s150_s24 }
   0x6   :  { %87 = vperm.xlu0 %166, %v25_v4   ;;  %v31_v8 = vsel %vm29_vm0, %v20_v6, -inf  ;;  %v32_v9 = vsel %vm29_vm0, %v21_v7, -inf  ;;  %v33_v12 = vsel %vm29_vm0, %v22_v10, -inf  ;;  %v158_v28 = vsel %vm51_vm2, 1.0, %v203_v3  ;;  %s178_s26 = scalar_lea.vmem %s151_s24, 16  ;;  %s182_s27 = scalar_lea.vmem %s151_s24, 32 }
   0x7   :  { %v34_v11 = vmax.f32 %v31_v8, %v32_v9  ;;  %v159_v29 = vsel %vm52_vm3, 1.0, %v203_v3  ;;  %v160_v33 = vsel %vm53_vm4, 1.0, %v203_v3  ;;  %v82_v34 = vshrl.u32 %v27_v5, 7  ;;  %p179_p0 = scmp.ne.s32.totalorder %s151_s24, %s178_s26  ;;  %p183_p1 = scmp.lt.s32.totalorder %s151_s24, %s151_s24 }
   0x8   :  { %v60_v38 = vmul.f32 %v158_v28, %v20_v6  ;;  %v61_v39 = vmul.f32 %v159_v29, %v21_v7  ;;  %v62_v45 = vmul.f32 %v160_v33, %v22_v10  ;;  %vm122_vm5 = vcmp.ge.s32.totalorder %v23_v22, 0  ;;  %p184_p2 = scmp.lt.s32.totalorder %s182_s27, %s178_s26 }
   0x9   :  { %v243_v13 = vmax.f32 %v34_v11, %v33_v12  ;;  %v83_v41 = vsub.s32 0, %v82_v34  ;;  %v124_v11 = vld [vmem:[#allocation2] sm:$0x1]  ;;  %vm142_vm6 = vcmask 0  }
   0xa   :  { %v63_v43 = vsel %vm45_vm1, %v60_v38, 0.0  ;;  %v64_v44 = vsel %vm45_vm1, %v61_v39, 0.0  ;;  %v66_v53 = vsel %vm45_vm1, %v62_v45, 0.0  ;;  %p185_p3 = por %p184_p2, %p183_p1 }
   0xb   :  { %v36_v14 = vsub.f32 %v20_v6, %v243_v13  ;;  %v37_v15 = vsub.f32 %v21_v7, %v243_v13  ;;  %v38_v17 = vsub.f32 %v22_v10, %v243_v13  ;;  %v65_v52 = vadd.f32 %v64_v44, %v63_v43 }
   0xc   :  { %p186_p4 = pnand %p185_p3, %p179_p0 }
   0xd   :  { %v39_v16 = vmul.f32 1.442695, %v36_v14  ;;  %v41_v18 = vmul.f32 1.442695, %v37_v15  ;;  %v43_v19 = vmul.f32 1.442695, %v38_v17  ;;  %v67_v59 = vadd.f32 %v66_v53, %v65_v52 }
   0xf   :  { %168 = vpow2.f32 %v39_v16  ;;  %v111_v3 = vsub.f32 %v67_v59, %v243_v13 }
  0x10   :  { %170 = vpow2.f32 %v41_v18 }
  0x11   :  { %172 = vpow2.f32 %v43_v19 }
  0x19   :  { %v169_v20 = vpop.eup %168 }
  0x1a   :  { %v171_v21 = vpop.eup %170  ;;  %v46_v23 = vsel %vm45_vm1, %v169_v20, 0.0  ;;  %v68_v31 = vmul.f32 %v169_v20, %v158_v28 }
  0x1b   :  { %v47_v24 = vsel %vm45_vm1, %v171_v21, 0.0  ;;  %v173_v25 = vpop.eup %172  ;;  %v69_v32 = vmul.f32 %v171_v21, %v159_v29 }
  0x1c   :  { %v48_v26 = vadd.f32 %v47_v24, %v46_v23  ;;  %v49_v27 = vsel %vm45_vm1, %v173_v25, 0.0  ;;  %v71_v35 = vsel %vm45_vm1, %v68_v31, 0.0  ;;  %v70_v37 = vmul.f32 %v173_v25, %v160_v33 }
  0x1d   :  { %v72_v36 = vsel %vm45_vm1, %v69_v32, 0.0 }
  0x1e   :  { %v50_v30 = vadd.f32 %v49_v27, %v48_v26  ;;  %v73_v40 = vadd.f32 %v72_v36, %v71_v35  ;;  %v74_v42 = vsel %vm45_vm1, %v70_v37, 0.0 }
  0x20   :  { %174 = vrcp.f32 %v50_v30  ;;  %v75_v48 = vadd.f32 %v74_v42, %v73_v40 }
  0x21   :  { %176 = vlog2.f32 %v50_v30 }
  0x2a   :  { %v175_v49 = vpop.eup %174 }
  0x2b   :  { %v116_v55 = vmul.f32 %v175_v49, %v75_v48  ;;  %v177_v60 = vpop.eup %176 }
  0x2c   :  { %v113_v4 = vmul.f32 0.6931472, %v177_v60 }
  0x2d   :  { %v117_v62 = vsub.f32 1.0, %v116_v55 }
  0x2e   :  { %v114_v7 = vsub.f32 %v111_v3, %v113_v4 }
  0x2f   :  { %v118_v6 = vmul.f32 %v117_v62, %v117_v62 }
  0x81   :  { %v79_v46 = vpop.permute.xlu0 %78  ;;  %v97_v47 = vpop.permute.xlu1 %96 }
  0x82   :  { %v84_v50 = vrot.slane %v79_v46, %v83_v41  ;;  %v102_v51 = vrot.slane %v97_v47, %v83_v41 }
  0x84   :  { %v103_v56 = vmul.f32 %v158_v28, %v84_v50  ;;  %v105_v58 = vmul.f32 %v160_v33, %v102_v51 }
  0x85   :  { %v88_v54 = vpop.permute.xlu0 %87 }
  0x86   :  { %v93_v57 = vrot.slane %v88_v54, %v83_v41  ;;  %v106_v63 = vsel %vm45_vm1, %v103_v56, 0.0  ;;  %v109_v1 = vsel %vm45_vm1, %v105_v58, 0.0 }
  0x88   :  { %v104_v61 = vmul.f32 %v159_v29, %v93_v57 }
  0x8a   :  { %v107_v0 = vsel %vm45_vm1, %v104_v61, 0.0 }
  0x8b   :  { %v108_v2 = vadd.f32 %v107_v0, %v106_v63 }
  0x8d   :  { %v110_v5 = vadd.f32 %v109_v1, %v108_v2 }
  0x8f   :  { %v119_v8 = vsub.f32 0.0, %v110_v5 }
  0x91   :  { %v120_v9 = vmul.f32 %v119_v8, %v118_v6 }
  0x93   :  { %v121_v10 = vmul.f32 %v120_v9, %v114_v7 }
  0x95   :  { %v123_v12 = vsel %vm122_vm5, %v121_v10, 0.0 }
  0x96   :  { %v125_v14 = vadd.f32 %v124_v11, %v123_v12 }
  0x98   :  { %126 = vst [vmem:[#allocation2] sm:$0x1] %v125_v14 }
  0x9f   :  { %v130_v15 = vld [vmem:[#allocation2] sm:$0x1] }
  0xa0   :  { %v131_v16 = vsel %vm45_vm1, %v130_v15, 0.0 }
  0xa1   :  { %132 = vadd.xlane.f32.xlu1 %v131_v16 }
 0x12e   :  { %v133_v17 = vpop.xlane.xlu1 %132 }
 0x12f   :  { %v134_v18 = vrot.slane %v133_v17, 4 }
 0x131   :  { %v135_v19 = vadd.f32 %v134_v18, %v133_v17 }
 0x133   :  { %v136_v13 = vrot.slane %v135_v19, 2 }
 0x135   :  { %v137_v20 = vadd.f32 %v136_v13, %v135_v19 }
 0x137   :  { %v138_v21 = vrot.slane %v137_v20, 1 }
 0x139   :  { %v139_v23 = vadd.f32 %v138_v21, %v137_v20 }
 0x13b   :  { %161 = vpush %v139_v23 }
 0x16c   :  { %s162_s25 = spop %161 }
 0x16d   :  { %v141_v22 = vstv %s162_s25 }
 0x16e   :  { %143 = vst.msk [vmem:[#allocation3] sm:$0x1] %vm142_vm6, %v141_v22 }
 0x16f   :  { %189 = shalt.err (!%p186_p4)
}
 0x170   :  { %s190_s30 = scalar_lea.hbm %s280_s3, 16 }
 0x171   :  { %p191_p5 = scmp.ne.s32.totalorder %s280_s3, %s190_s30  ;;  %p194_p6 = scmp.lt.u32.totalorder %s190_s30, %s280_s3 }
 0x173   :  { %p196_p7 = pnand %p194_p6, %p191_p5 }
 0x175   :  { %199 = shalt.err (!%p196_p7)
}
 0x176   :  { %153 = dma.vmem_to_hbm [thread:$0]  %s151_s24, 16, %s280_s3, [#allocation4]  }
 0x177   :  { %200 = dma.done.wait [#allocation4], 16  }
 0x178   :  { %201 = vsyncadd [#allocation4], 4294967280 }
 0x179   :  { %157 = vsyncpa [#allocation4], 1 }

</bundles_post_ra>
